<compile_context>
chip_gen: v6e
topology: v6e:2x2x1
jax: 0.10.0
libtpu: 0.0.40
codegen_flags: <defaults>
</compile_context>

<pallas_src>
import functools

import jax
import jax.numpy as jnp
from jax.experimental import pallas as pl
from jax.experimental.pallas import tpu as pltpu


def _round_up(x, m):
    return ((x + m - 1) // m) * m


def _fused_kernel(z_ref, u_ref, w_ref, o_ref, *, num_node, u_node, hidden_dim,
                  forecast_len, fo, output_size, batch_block):
    """Fused true_u_encoder + end_conv + end_fc for `batch_block` batch items.

    z_ref : (batch_block, H, N)   transposed last-time-step node states
    u_ref : (batch_block, F, U)   true_u (already in (F, U) layout per batch)
    w_ref : (rows, lanes)         packed constant slab (see wrapper)
    o_ref : (batch_block, F*O, S) fc output, transposed (row c = f*O+o, lane s)
    """
    N, U, H, F, S = num_node, u_node, hidden_dim, forecast_len, output_size

    # Static row offsets into the packed constant slab (8-sublane aligned).
    r_enc = 0
    r_conv = r_enc + _round_up(H, 8)
    r_fcz = r_conv + _round_up(fo, 8)
    r_fcu = r_fcz + _round_up(N, 8)
    r_bias = r_fcu + _round_up(U, 8)

    w_enc_t = w_ref[r_enc:r_enc + H, :F]          # (H, F)   true_u_encoder^T
    w_conv_t = w_ref[r_conv:r_conv + fo, :H]      # (FO, H)  end_conv^T
    w_fc_z_t = w_ref[r_fcz:r_fcz + N, :S]         # (N, S)   end_fc (z part)^T
    w_fc_u_t = w_ref[r_fcu:r_fcu + U, :S]         # (U, S)   end_fc (u part)^T
    bias_t = w_ref[r_bias:r_bias + fo, :S]        # (FO, S)  fused conv+fc bias

    # Static unroll over the batch items handled by this grid step.
    for b in range(batch_block):
        # hidden_u^T = w_enc^T @ u^T                         -> (H, U)
        hu_t = jnp.dot(w_enc_t, u_ref[b], preferred_element_type=jnp.float32)
        # K = zcat^T @ w_fc^T, split so the [N+U, H] concat never materializes
        k = (jnp.dot(z_ref[b], w_fc_z_t, preferred_element_type=jnp.float32)
             + jnp.dot(hu_t, w_fc_u_t, preferred_element_type=jnp.float32))   # (H, S)
        # fc^T = w_conv^T @ K + fused_bias                    -> (FO, S)
        o_ref[b] = (jnp.dot(w_conv_t, k, preferred_element_type=jnp.float32)
                    + bias_t)


@functools.partial(jax.jit, static_argnames=(
    "num_node", "hidden_dim", "output_dim", "forecast_len", "output_size",
    "grid_steps"))
def out_func_conv_forward(params, sde_out, true_u, *, num_node, hidden_dim,
                          output_dim, forecast_len, output_size, grid_steps=1):
    """grid_steps=1 (default) is best on v5e/v6e; use grid_steps=2 on v7x so
    both TensorCores receive one 'parallel' grid step each."""
    N, H, O, F, S = num_node, hidden_dim, output_dim, forecast_len, output_size
    if O * H != H:
        # Same limitation as the torch module: cat([z, hidden_u], dim=2)
        # requires output_dim * hidden_dim == hidden_dim, i.e. output_dim == 1.
        raise ValueError("Out_func_conv only supports output_dim == 1")
    T, B = sde_out.shape[0], sde_out.shape[1]
    U = true_u.shape[2]
    FO = F * O
    if B % grid_steps != 0:
        raise ValueError("batch must be divisible by grid_steps")
    bb = B // grid_steps
    f32 = jnp.float32

    # ---- per-call data, laid out for the transposed in-kernel contractions ----
    # z_t[b] = z[b]^T : (H, N)  (last time step, slow half of the SDE state)
    z_nodes = sde_out.reshape(T, B, N, H, 2)[-1, :, :, :, -1]        # (B, N, H)
    z_t = jnp.transpose(z_nodes, (0, 2, 1)).astype(f32)              # (B, H, N)
    # u_t[b] = true_u[b]^T over (node, time): true_u already stores (F, U).
    u_t = true_u[..., 0].astype(f32)                                 # (B, F, U)

    # ---- constants: transposed weights + fused bias, packed into ONE slab ----
    w_enc_t = params["w_enc"][:, 0, 0, :].astype(f32)                # (H, F)
    w_conv_t = params["w_conv"][:, 0, 0, :].astype(f32)              # (FO, H)
    w_fc = params["w_fc"].astype(f32)                                # (S, N+U)
    w_fc_z_t = jnp.transpose(w_fc[:, :N])                            # (N, S)
    w_fc_u_t = jnp.transpose(w_fc[:, N:])                            # (U, S)
    # bias folded through end_fc: bias_t[c, s] = b_conv[c]*sum_n w_fc[s,n] + b_fc[s]
    bias_t = (params["b_conv"].astype(f32)[:, None]
              * jnp.sum(w_fc, axis=1)[None, :]
              + params["b_fc"].astype(f32)[None, :])                 # (FO, S)

    lanes = _round_up(max(F, H, S), 128)
    r_enc = 0
    r_conv = r_enc + _round_up(H, 8)
    r_fcz = r_conv + _round_up(FO, 8)
    r_fcu = r_fcz + _round_up(N, 8)
    r_bias = r_fcu + _round_up(U, 8)
    rows = r_bias + _round_up(FO, 8)

    slab = jnp.zeros((rows, lanes), f32)
    slab = slab.at[r_enc:r_enc + H, :F].set(w_enc_t)
    slab = slab.at[r_conv:r_conv + FO, :H].set(w_conv_t)
    slab = slab.at[r_fcz:r_fcz + N, :S].set(w_fc_z_t)
    slab = slab.at[r_fcu:r_fcu + U, :S].set(w_fc_u_t)
    slab = slab.at[r_bias:r_bias + FO, :S].set(bias_t)

    kernel = functools.partial(
        _fused_kernel, num_node=N, u_node=U, hidden_dim=H, forecast_len=F,
        fo=FO, output_size=S, batch_block=bb)

    out_t = pl.pallas_call(
        kernel,
        grid=(grid_steps,),
        out_shape=jax.ShapeDtypeStruct((B, FO, S), jnp.float32),
        in_specs=[
            pl.BlockSpec((bb, H, N), lambda g: (g, 0, 0)),     # z_t   (per step)
            pl.BlockSpec((bb, F, U), lambda g: (g, 0, 0)),     # u_t   (per step)
            pl.BlockSpec((rows, lanes), lambda g: (0, 0)),     # packed constants
        ],
        out_specs=pl.BlockSpec((bb, FO, S), lambda g: (g, 0, 0)),
        compiler_params=pltpu.CompilerParams(
            dimension_semantics=("parallel",)),
    )(z_t, u_t, slab)

    # torch epilogue: reshape(-1, F, O, S).permute(0, 1, 3, 2) -> (B, F, S, O)
    return jnp.transpose(out_t.reshape(B, F, O, S), (0, 1, 3, 2))


# ---------------- pure-JAX reference (literal torch transcription) ----------------

def reference_forward(params, sde_out, true_u, num_node, hidden_dim,
                      output_dim, forecast_len, output_size):
    N, H, O, F, S = num_node, hidden_dim, output_dim, forecast_len, output_size
    T, B = sde_out.shape[0], sde_out.shape[1]
    s = sde_out.reshape(T, B, N, H, 2)[..., -1]                    # [T,B,N,H]
    z = jnp.swapaxes(s[-1:], 0, 1)                                 # [B,1,N,H]
    tu = jnp.transpose(true_u, (0, 3, 2, 1))                       # [B,1,U,F]
    hu = jnp.einsum("buf,cf->bcu", tu[:, 0], params["w_enc"][:, 0, 0, :])
    hu = jnp.transpose(hu[..., None], (0, 3, 2, 1))                # [B,1,U,O*H]
    zc = jnp.concatenate([z, hu], axis=2)                          # [B,1,N+U,H]
    conv = (jnp.einsum("bnh,ch->bcn", zc[:, 0], params["w_conv"][:, 0, 0, :])
            + params["b_conv"][None, :, None])                     # [B,F*O,N+U]
    fc = (jnp.einsum("bcn,sn->bcs", conv, params["w_fc"])
          + params["b_fc"][None, None, :])                         # [B,F*O,S]
    return jnp.transpose(fc.reshape(B, F, O, S), (0, 1, 3, 2))     # [B,F,S,O]


# ------------------------------------- main -------------------------------------

if __name__ == "__main__":
    key = jax.random.PRNGKey(0)
    B, T = 2, 6
    N, H, O = 8, 32, 1            # num_node, hidden_dim, output_dim
    U, F, S = 8, 4, 16            # u_node, forecast_len, output_size
    D = N * H * 2                 # flat SDE state per batch element

    keys = jax.random.split(key, 7)
    params = {
        "w_enc":  0.1 * jax.random.normal(keys[0], (O * H, 1, 1, F), jnp.float32),
        "w_conv": 0.1 * jax.random.normal(keys[1], (F * O, 1, 1, H), jnp.float32),
        "b_conv": 0.1 * jax.random.normal(keys[2], (F * O,), jnp.float32),
        "w_fc":   0.1 * jax.random.normal(keys[3], (S, N + U), jnp.float32),
        "b_fc":   0.1 * jax.random.normal(keys[4], (S,), jnp.float32),
    }
    sde_out = jax.random.normal(keys[5], (T, B, D), jnp.float32)
    true_u = jax.random.normal(keys[6], (B, F, U, 1), jnp.float32)

    ref = reference_forward(params, sde_out, true_u, N, H, O, F, S)

    # Default: single grid step (best on v5e/v6e — everything in one push).
    out = out_func_conv_forward(params, sde_out, true_u,
                                num_node=N, hidden_dim=H, output_dim=O,
                                forecast_len=F, output_size=S)
    jax.block_until_ready(out)
    assert out.shape == (B, F, S, O), out.shape
    assert bool(jnp.all(jnp.isfinite(out)))
    max_err = float(jnp.max(jnp.abs(out - ref)))
    assert max_err < 2e-2, f"mismatch vs reference: {max_err}"

    # v7x-style variant: split the batch over 2 "parallel" grid steps so both
    # TensorCores get work; numerically identical.
    out2 = out_func_conv_forward(params, sde_out, true_u,
                                 num_node=N, hidden_dim=H, output_dim=O,
                                 forecast_len=F, output_size=S, grid_steps=2)
    jax.block_until_ready(out2)
    max_err2 = float(jnp.max(jnp.abs(out2 - ref)))
    assert max_err2 < 2e-2, f"mismatch vs reference (grid_steps=2): {max_err2}"

    print("KERNEL_OK")
</pallas_src>

<mosaic_0001>
module attributes {stable_mosaic.version = 11 : i64} {
  func.func @_fused_kernel(%arg0: i32, %arg1: memref<2x32x8xf32, #tpu.memory_space<vmem>>, %arg2: memref<2x4x8xf32, #tpu.memory_space<vmem>>, %arg3: memref<64x128xf32, #tpu.memory_space<vmem>>, %arg4: memref<2x4x16xf32, #tpu.memory_space<vmem>>) attributes {dimension_semantics = [#tpu.dimension_semantics<parallel>], iteration_bounds = array<i64: 1>, scalar_prefetch = 0 : i64, scratch_operands = 0 : i64, tpu.core_type = #tpu.core_type<tc>, window_params = [{transform_indices = @transform_0, window_bounds = array<i64: 2, 32, 8>}, {transform_indices = @transform_1, window_bounds = array<i64: 2, 4, 8>}, {pipeline_mode = #tpu.pipeline_mode<synchronous>, transform_indices = @transform_2, window_bounds = array<i64: 64, 128>}, {transform_indices = @transform_3, window_bounds = array<i64: 2, 4, 16>}]} {
    %c0 = arith.constant 0 : index
    %c0_0 = arith.constant 0 : index
    %0 = vector.load %arg3[%c0, %c0_0] : memref<64x128xf32, #tpu.memory_space<vmem>>, vector<32x4xf32>
    %c32 = arith.constant 32 : index
    %c0_1 = arith.constant 0 : index
    %1 = vector.load %arg3[%c32, %c0_1] : memref<64x128xf32, #tpu.memory_space<vmem>>, vector<4x32xf32>
    %c40 = arith.constant 40 : index
    %c0_2 = arith.constant 0 : index
    %2 = vector.load %arg3[%c40, %c0_2] : memref<64x128xf32, #tpu.memory_space<vmem>>, vector<8x16xf32>
    %c48 = arith.constant 48 : index
    %c0_3 = arith.constant 0 : index
    %3 = vector.load %arg3[%c48, %c0_3] : memref<64x128xf32, #tpu.memory_space<vmem>>, vector<8x16xf32>
    %c56 = arith.constant 56 : index
    %c0_4 = arith.constant 0 : index
    %4 = vector.load %arg3[%c56, %c0_4] : memref<64x128xf32, #tpu.memory_space<vmem>>, vector<4x16xf32>
    %c0_5 = arith.constant 0 : index
    %c0_6 = arith.constant 0 : index
    %c0_7 = arith.constant 0 : index
    %5 = vector.load %arg2[%c0_5, %c0_6, %c0_7] : memref<2x4x8xf32, #tpu.memory_space<vmem>>, vector<1x4x8xf32>
    %6 = vector.shape_cast %5 : vector<1x4x8xf32> to vector<4x8xf32>
    %cst = arith.constant dense<0.000000e+00> : vector<32x8xf32>
    %7 = tpu.matmul %0, %6, %cst {dimension_numbers = #tpu.dot_dimension_numbers<[1], [0], [0], [1], [0, 0, 1, 1], [], []>} : vector<32x4xf32>, vector<4x8xf32>, vector<32x8xf32> -> vector<32x8xf32>
    %c0_8 = arith.constant 0 : index
    %c0_9 = arith.constant 0 : index
    %c0_10 = arith.constant 0 : index
    %8 = vector.load %arg1[%c0_8, %c0_9, %c0_10] : memref<2x32x8xf32, #tpu.memory_space<vmem>>, vector<1x32x8xf32>
    %9 = vector.shape_cast %8 : vector<1x32x8xf32> to vector<32x8xf32>
    %cst_11 = arith.constant dense<0.000000e+00> : vector<32x16xf32>
    %10 = tpu.matmul %9, %2, %cst_11 {dimension_numbers = #tpu.dot_dimension_numbers<[1], [0], [0], [1], [0, 0, 1, 1], [], []>} : vector<32x8xf32>, vector<8x16xf32>, vector<32x16xf32> -> vector<32x16xf32>
    %cst_12 = arith.constant dense<0.000000e+00> : vector<32x16xf32>
    %11 = tpu.matmul %7, %3, %cst_12 {dimension_numbers = #tpu.dot_dimension_numbers<[1], [0], [0], [1], [0, 0, 1, 1], [], []>} : vector<32x8xf32>, vector<8x16xf32>, vector<32x16xf32> -> vector<32x16xf32>
    %12 = arith.addf %10, %11 : vector<32x16xf32>
    %cst_13 = arith.constant dense<0.000000e+00> : vector<4x16xf32>
    %13 = tpu.matmul %1, %12, %cst_13 {dimension_numbers = #tpu.dot_dimension_numbers<[1], [0], [0], [1], [0, 0, 1, 1], [], []>} : vector<4x32xf32>, vector<32x16xf32>, vector<4x16xf32> -> vector<4x16xf32>
    %14 = arith.addf %13, %4 : vector<4x16xf32>
    %c0_14 = arith.constant 0 : index
    %c0_15 = arith.constant 0 : index
    %c0_16 = arith.constant 0 : index
    %15 = vector.load %arg4[%c0_14, %c0_15, %c0_16] : memref<2x4x16xf32, #tpu.memory_space<vmem>>, vector<1x4x16xf32>
    %16 = vector.shape_cast %15 : vector<1x4x16xf32> to vector<4x16xf32>
    %17 = vector.shape_cast %14 : vector<4x16xf32> to vector<1x4x16xf32>
    tpu.vector_store %arg4[%c0_14, %c0_15, %c0_16], %17 {strides = array<i32>} : memref<2x4x16xf32, #tpu.memory_space<vmem>>, vector<1x4x16xf32>,
    %c1 = arith.constant 1 : index
    %c0_17 = arith.constant 0 : index
    %c0_18 = arith.constant 0 : index
    %18 = vector.load %arg2[%c1, %c0_17, %c0_18] : memref<2x4x8xf32, #tpu.memory_space<vmem>>, vector<1x4x8xf32>
    %19 = vector.shape_cast %18 : vector<1x4x8xf32> to vector<4x8xf32>
    %cst_19 = arith.constant dense<0.000000e+00> : vector<32x8xf32>
    %20 = tpu.matmul %0, %19, %cst_19 {dimension_numbers = #tpu.dot_dimension_numbers<[1], [0], [0], [1], [0, 0, 1, 1], [], []>} : vector<32x4xf32>, vector<4x8xf32>, vector<32x8xf32> -> vector<32x8xf32>
    %c1_20 = arith.constant 1 : index
    %c0_21 = arith.constant 0 : index
    %c0_22 = arith.constant 0 : index
    %21 = vector.load %arg1[%c1_20, %c0_21, %c0_22] : memref<2x32x8xf32, #tpu.memory_space<vmem>>, vector<1x32x8xf32>
    %22 = vector.shape_cast %21 : vector<1x32x8xf32> to vector<32x8xf32>
    %cst_23 = arith.constant dense<0.000000e+00> : vector<32x16xf32>
    %23 = tpu.matmul %22, %2, %cst_23 {dimension_numbers = #tpu.dot_dimension_numbers<[1], [0], [0], [1], [0, 0, 1, 1], [], []>} : vector<32x8xf32>, vector<8x16xf32>, vector<32x16xf32> -> vector<32x16xf32>
    %cst_24 = arith.constant dense<0.000000e+00> : vector<32x16xf32>
    %24 = tpu.matmul %20, %3, %cst_24 {dimension_numbers = #tpu.dot_dimension_numbers<[1], [0], [0], [1], [0, 0, 1, 1], [], []>} : vector<32x8xf32>, vector<8x16xf32>, vector<32x16xf32> -> vector<32x16xf32>
    %25 = arith.addf %23, %24 : vector<32x16xf32>
    %cst_25 = arith.constant dense<0.000000e+00> : vector<4x16xf32>
    %26 = tpu.matmul %1, %25, %cst_25 {dimension_numbers = #tpu.dot_dimension_numbers<[1], [0], [0], [1], [0, 0, 1, 1], [], []>} : vector<4x32xf32>, vector<32x16xf32>, vector<4x16xf32> -> vector<4x16xf32>
    %27 = arith.addf %26, %4 : vector<4x16xf32>
    %c1_26 = arith.constant 1 : index
    %c0_27 = arith.constant 0 : index
    %c0_28 = arith.constant 0 : index
    %28 = vector.load %arg4[%c1_26, %c0_27, %c0_28] : memref<2x4x16xf32, #tpu.memory_space<vmem>>, vector<1x4x16xf32>
    %29 = vector.shape_cast %28 : vector<1x4x16xf32> to vector<4x16xf32>
    %30 = vector.shape_cast %27 : vector<4x16xf32> to vector<1x4x16xf32>
    tpu.vector_store %arg4[%c1_26, %c0_27, %c0_28], %30 {strides = array<i32>} : memref<2x4x16xf32, #tpu.memory_space<vmem>>, vector<1x4x16xf32>,
    return
  }
  func.func @transform_0(%arg0: i32) -> (i32, i32, i32) {
    %c0_i32 = arith.constant 0 : i32
    %c0_i32_0 = arith.constant 0 : i32
    %c0_i32_1 = arith.constant 0 : i32
    return %arg0, %c0_i32, %c0_i32_0 : i32, i32, i32
  }
  func.func @transform_1(%arg0: i32) -> (i32, i32, i32) {
    %c0_i32 = arith.constant 0 : i32
    %c0_i32_0 = arith.constant 0 : i32
    %c0_i32_1 = arith.constant 0 : i32
    return %arg0, %c0_i32, %c0_i32_0 : i32, i32, i32
  }
  func.func @transform_2(%arg0: i32) -> (i32, i32) {
    %c0_i32 = arith.constant 0 : i32
    %c0_i32_0 = arith.constant 0 : i32
    %c0_i32_1 = arith.constant 0 : i32
    return %c0_i32, %c0_i32_0 : i32, i32
  }
  func.func @transform_3(%arg0: i32) -> (i32, i32, i32) {
    %c0_i32 = arith.constant 0 : i32
    %c0_i32_0 = arith.constant 0 : i32
    %c0_i32_1 = arith.constant 0 : i32
    return %arg0, %c0_i32, %c0_i32_0 : i32, i32, i32
  }
}

</mosaic_0001>

<bundles_post_ra>
// kernel: out_func_conv_forward.1
= control target key start
LH: loop header
LB: loop body
LE: loop exit
PB: predicated region body
PF: predicated region fallthrough
CT: control target
= control target key end

     0   :  { %vm37_vm0 = vcmask 1043456   ;;  %vm24_vm1 = vcmask 31744   ;;  %s1092_s0 = inlined_call_operand.vmem [shape: f32[2,32,8], index: 0, kind: input, shape index: {}]   ;;  %s1093_s1 = inlined_call_operand.vmem [shape: f32[2,4,8], index: 1, kind: input, shape index: {}]   ;;  %s1094_s2 = inlined_call_operand.vmem [shape: f32[64,128], index: 2, kind: input, shape index: {}]   ;;  %s1095_s3 = inlined_call_operand.hbm [shape: f32[2,4,16], index: 3, kind: output, shape index: {}]  }
   0x1   :  { %v23_v0 = vld [vmem:[%s1093_s1] sm:$0xf]  ;;  %v984_v2 = vld [vmem:[%s1094_s2 + $0x8] sm:$0xff]  ;;  %v992_v3 = vld [vmem:[%s1094_s2 + $0x10] sm:$0xff] }
   0x2   :  { %v979_v1 = vld [vmem:[%s1094_s2] sm:$0xff]  ;;  %851 = vmatprep.subr.msk.mxu0 %vm37_vm0, %v23_v0  ;;  %v997_v4 = vld [vmem:[%s1094_s2 + $0x28] sm:$0xff] }
   0x3   :  { %853 = vmatprep.mubr.msk.f32.mxu0 %vm24_vm1, %v979_v1  ;;  %852 = vmatpush3.msk.msra.mxu0 %vm37_vm0, %v23_v0 }
   0x4   :  { %8 = vsyncpa [#allocation3], 0  ;;  %854 = vmatmul.mubr.msk.f32.vlgmr.msra.gmra.mxu0 %vm24_vm1, %v984_v2  ;;  %867 = vmatprep.subr.mxu0 %v997_v4  ;;  %v18_v5 = vld [vmem:[%s1094_s2 + $0x18] sm:$0xff]  ;;  %v126_v6 = vld [vmem:[%s1092_s0] sm:$0xff]  ;;  %vm130_vm2 = vcmask 64512   ;;  %v948_v15 = vmov 0.0  }
   0x5   :  { %856 = vmatprep.mubr.msk.f32.mxu0 %vm24_vm1, %v992_v3  ;;  %868 = vmatpush3.msra.mxu0 %v997_v4  ;;  %v21_v7 = vld [vmem:[%s1094_s2 + $0x30] sm:$0xff]  ;;  %v127_v8 = vld [vmem:[%s1092_s0 + $0x8] sm:$0xff]  ;;  %v129_v10 = vld [vmem:[%s1092_s0 + $0x18] sm:$0xff]  ;;  %vm949_vm3 = vmmov 0   ;;  %vm325_vm4 = vcmask 261120   ;;  %vm399_vm5 = vcmask 125952  }
   0x6   :  { %859 = vmatprep.subr.mxu1 %v21_v7  ;;  %894 = vmatprep.subr.mxu0 %v21_v7  ;;  %v128_v9 = vld [vmem:[%s1092_s0 + $0x10] sm:$0xff]  ;;  %v19_v28 = vld [vmem:[%s1094_s2 + $0x20] sm:$0xf]  ;;  %v792_v29 = vld [vmem:[%s1093_s1 + $0x4] sm:$0xf] }
   0x7   :  { %860 = vmatpush3.msra.mxu1 %v21_v7  ;;  %v798_v30 = vld [vmem:[%s1092_s0 + $0x20] sm:$0xff]  ;;  %v799_v31 = vld [vmem:[%s1092_s0 + $0x28] sm:$0xff]  ;;  %v800_v32 = vld [vmem:[%s1092_s0 + $0x30] sm:$0xff] }
   0x8   :  { %857 = vmatmul.mubr.msk.f32.gmra.mxu0 %vm24_vm1, %v18_v5  ;;  %875 = vmatprep.subr.mxu1 %v948_v15  ;;  %v801_v33 = vld [vmem:[%s1092_s0 + $0x38] sm:$0xff]  ;;  %s950_s0 = smov [#allocation2]  }
   0x9   :  { %869 = vmatprep.mubr.msk.f32.mxu0 %vm130_vm2, %v126_v6  ;;  %v22_v34 = vld [vmem:[%s1094_s2 + $0x38] sm:$0xf]  ;;  %s767_s2 = sshll.u32 %s950_s0, 4  ;;  %s768_s2 = int_to_ptr.vmem [resolvable:$true] %s767_s2 }
   0xa   :  { %s926_s20 = scalar_lea.vmem %s768_s2, 128  ;;  %p931_p1 = scmp.lt.s32.totalorder %s768_s2, %s768_s2 }
   0xb   :  { %p927_p0 = scmp.ne.s32.totalorder %s768_s2, %s926_s20  ;;  %p932_p2 = scmp.lt.s32.totalorder %s926_s20, %s926_s20 }
   0xc   :  { %870 = vmatmul.mubr.msk.f32.vlgmr.msra.gmra.mxu0 %vm130_vm2, %v127_v8 }
   0xd   :  { %895 = vmatpush3.msra.mxu0 %v21_v7  ;;  %872 = vmatprep.mubr.msk.f32.mxu0 %vm130_vm2, %v128_v9  ;;  %p933_p3 = por %p932_p2, %p931_p1 }
   0xe   :  { %910 = vmatprep.subr.mxu0 %v948_v15 }
   0xf   :  { %p934_p4 = pnand %p933_p3, %p927_p0 }
  0x10   :  { %873 = vmatmul.mubr.msk.f32.gmra.mxu0 %vm130_vm2, %v129_v10 }
  0xc4   :  { %v855_v11 = vpop.f32.mrf.mxu0 }
  0xc6   :  { %v107_v12 = vpop.f32.mrf.mxu0 }
  0xc7   :  { %861 = vmatprep.mubr.msk.f32.mxu1 %vm130_vm2, %v107_v12 }
  0xc8   :  { %v858_v13 = vpop.f32.mrf.mxu0  ;;  %862 = vmatmul.mubr.msk.f32.vlgmr.msra.gmra.mxu1 %vm130_vm2, %v855_v11 }
  0xca   :  { %v117_v14 = vpop.f32.mrf.mxu0 }
  0xcb   :  { %864 = vmatprep.mubr.msk.f32.mxu1 %vm130_vm2, %v117_v14 }
  0xcc   :  { %865 = vmatmul.mubr.msk.f32.gmra.mxu1 %vm130_vm2, %v858_v13  ;;  %v871_v16 = vpop.f32.mrf.mxu0 }
  0xcd   :  { %883 = vmatprep.mubr.msk.f32.mxu1 %vm949_vm3, %v948_v15 }
  0xce   :  { %v306_v17 = vpop.f32.mrf.mxu0 }
  0xd0   :  { %v874_v20 = vpop.f32.mrf.mxu0 }
  0xd2   :  { %v316_v23 = vpop.f32.mrf.mxu0 }
 0x188   :  { %v863_v18 = vpop.f32.mrf.mxu1 }
 0x189   :  { %v312_v26 = vadd.f32 %v871_v16, %v863_v18 }
 0x18a   :  { %v209_v19 = vpop.f32.mrf.mxu1 }
 0x18b   :  { %v307_v27 = vadd.f32 %v306_v17, %v209_v19 }
 0x18c   :  { %v866_v21 = vpop.f32.mrf.mxu1 }
 0x18d   :  { %v322_v22 = vadd.f32 %v874_v20, %v866_v21 }
 0x18e   :  { %v219_v24 = vpop.f32.mrf.mxu1 }
 0x18f   :  { %v317_v25 = vadd.f32 %v316_v23, %v219_v24  ;;  %876 = vmatpush3.msra.mxu1 %v322_v22 }
 0x190   :  { %877 = vmatprep.subr.mxu1 %v948_v15 }
 0x191   :  { %878 = vmatpush3.msra.mxu1 %v317_v25 }
 0x192   :  { %879 = vmatprep.subr.mxu1 %v948_v15 }
 0x193   :  { %880 = vmatpush3.msra.mxu1 %v312_v26 }
 0x194   :  { %881 = vmatprep.subr.mxu1 %v948_v15 }
 0x195   :  { %882 = vmatpush3.msra.mxu1 %v307_v27 }
 0x196   :  { %884 = vmatmul.mubr.msk.f32.vlgmr.msra.gmra.mxu1 %vm325_vm4, %v19_v28  ;;  %886 = vmatprep.subr.msk.mxu1 %vm37_vm0, %v792_v29 }
 0x197   :  { %887 = vmatpush3.msk.msra.mxu1 %vm37_vm0, %v792_v29  ;;  %888 = vmatprep.mubr.msk.f32.mxu1 %vm24_vm1, %v979_v1 }
 0x198   :  { %902 = vmatprep.subr.mxu1 %v997_v4 }
 0x19a   :  { %889 = vmatmul.mubr.msk.f32.vlgmr.msra.gmra.mxu1 %vm24_vm1, %v984_v2 }
 0x19b   :  { %891 = vmatprep.mubr.msk.f32.mxu1 %vm24_vm1, %v992_v3  ;;  %903 = vmatpush3.msra.mxu1 %v997_v4 }
 0x19e   :  { %892 = vmatmul.mubr.msk.f32.gmra.mxu1 %vm24_vm1, %v18_v5 }
 0x19f   :  { %904 = vmatprep.mubr.msk.f32.mxu1 %vm130_vm2, %v798_v30 }
 0x1a2   :  { %905 = vmatmul.mubr.msk.f32.vlgmr.msra.gmra.mxu1 %vm130_vm2, %v799_v31 }
 0x1a3   :  { %907 = vmatprep.mubr.msk.f32.mxu1 %vm130_vm2, %v800_v32 }
 0x1a6   :  { %908 = vmatmul.mubr.msk.f32.gmra.mxu1 %vm130_vm2, %v801_v33 }
 0x256   :  { %v395_v35 = vpop.f32.mrf.mxu1 }
 0x257   :  { %v396_v36 = vadd.f32 %v395_v35, %v22_v34 }
 0x258   :  { %v885_v37 = vpop.f32.mrf.mxu1 }
 0x259   :  { %400 = vst.msk [vmem:[#allocation2] sm:$0xf] %vm399_vm5, %v396_v36 }
 0x25a   :  { %v890_v38 = vpop.f32.mrf.mxu1 }
 0x25c   :  { %v472_v39 = vpop.f32.mrf.mxu1 }
 0x25d   :  { %896 = vmatprep.mubr.msk.f32.mxu0 %vm130_vm2, %v472_v39 }
 0x25e   :  { %v893_v40 = vpop.f32.mrf.mxu1  ;;  %897 = vmatmul.mubr.msk.f32.vlgmr.msra.gmra.mxu0 %vm130_vm2, %v890_v38 }
 0x260   :  { %v482_v41 = vpop.f32.mrf.mxu1 }
 0x261   :  { %899 = vmatprep.mubr.msk.f32.mxu0 %vm130_vm2, %v482_v41 }
 0x262   :  { %900 = vmatmul.mubr.msk.f32.gmra.mxu0 %vm130_vm2, %v893_v40  ;;  %v906_v42 = vpop.f32.mrf.mxu1 }
 0x263   :  { %918 = vmatprep.mubr.msk.f32.mxu0 %vm949_vm3, %v948_v15 }
 0x264   :  { %v671_v43 = vpop.f32.mrf.mxu1 }
 0x266   :  { %v909_v46 = vpop.f32.mrf.mxu1 }
 0x268   :  { %v681_v49 = vpop.f32.mrf.mxu1 }
 0x31e   :  { %v898_v44 = vpop.f32.mrf.mxu0 }
 0x31f   :  { %v677_v52 = vadd.f32 %v906_v42, %v898_v44 }
 0x320   :  { %v574_v45 = vpop.f32.mrf.mxu0 }
 0x321   :  { %v672_v53 = vadd.f32 %v671_v43, %v574_v45 }
 0x322   :  { %v901_v47 = vpop.f32.mrf.mxu0 }
 0x323   :  { %v687_v48 = vadd.f32 %v909_v46, %v901_v47 }
 0x324   :  { %v584_v50 = vpop.f32.mrf.mxu0 }
 0x325   :  { %v682_v51 = vadd.f32 %v681_v49, %v584_v50  ;;  %911 = vmatpush3.msra.mxu0 %v687_v48 }
 0x326   :  { %912 = vmatprep.subr.mxu0 %v948_v15 }
 0x327   :  { %913 = vmatpush3.msra.mxu0 %v682_v51 }
 0x328   :  { %914 = vmatprep.subr.mxu0 %v948_v15 }
 0x329   :  { %915 = vmatpush3.msra.mxu0 %v677_v52 }
 0x32a   :  { %916 = vmatprep.subr.mxu0 %v948_v15 }
 0x32b   :  { %917 = vmatpush3.msra.mxu0 %v672_v53 }
 0x32c   :  { %919 = vmatmul.mubr.msk.f32.vlgmr.msra.gmra.mxu0 %vm325_vm4, %v19_v28 }
 0x3ec   :  { %v756_v54 = vpop.f32.mrf.mxu0 }
 0x3ed   :  { %v757_v55 = vadd.f32 %v756_v54, %v22_v34 }
 0x3ee   :  { %v920_v56 = vpop.f32.mrf.mxu0 }
 0x3ef   :  { %761 = vst.msk [vmem:[#allocation2 + $0x4] sm:$0xf] %vm399_vm5, %v757_v55 }
 0x3f0   :  { %937 = shalt.err (!%p934_p4)
}
 0x3f1   :  { %s951_s21 = smov 64   ;;  %s952_s22 = smov 4  }
 0x3f2   :  { %773 = dma.vmem_to_hbm [thread:$0]  %s768_s2, 128, %s1095_s3, [#allocation3], %s951_s21, %s951_s21, %s952_s22  }
 0x3f3   :  { %946 = dma.done.wait [#allocation3], 128  }
 0x3f4   :  { %947 = vsyncadd [#allocation3], 4294967168 }
 0x3f5   :  { %777 = vsyncpa [#allocation3], 1 }

</bundles_post_ra>
